<compile_context>
chip_gen: v7x
topology: tpu7x:2x2x1
jax: 0.10.0
libtpu: 0.0.40
codegen_flags: <defaults>
</compile_context>

<pallas_src>
import functools

import jax
import jax.numpy as jnp
from jax.experimental import pallas as pl
from jax.experimental.pallas import tpu as pltpu

_LANE = 128
_SUBLANE = {4: 8, 2: 16, 1: 32}            # f32 / bf16 / int8 packed-sublane tile
_VMEM_WORKSET_BUDGET = 32 * 1024 * 1024    # per-step working set target
_VMEM_LIMIT_BYTES = 48 * 1024 * 1024       # scoped VMEM limit (< v7x 64 MiB phys)


def _round_up(a, b):
    return (a + b - 1) // b * b


def _int_pow(x, n):
    """x ** n for static integer n >= 1 via exponentiation-by-squaring (VPU muls)."""
    result = None
    base = x
    while n > 0:
        if n & 1:
            result = base if result is None else result * base
        n >>= 1
        if n:
            base = base * base
    return result


def _is_int_p(p):
    return abs(p - round(p)) < 1e-12 and round(p) >= 1


def _gem_kernel(x_ref, o_ref, acc_ref, *, p, eps, inv_hw, hw, block_hw, mask_hw):
    """One (block_nc, block_hw) tile: accumulate sum(clamp(x,eps)**p) per row."""
    j = pl.program_id(1)

    @pl.when(j == 0)
    def _init():
        acc_ref[...] = jnp.zeros_like(acc_ref)

    x = x_ref[...].astype(jnp.float32)
    xc = jnp.maximum(x, eps)                      # clamp(min=eps) -> strictly > 0

    if _is_int_p(p):
        xp = _int_pow(xc, int(round(p)))          # VPU multiplies, no EUP
    else:
        xp = jnp.exp(p * jnp.log(xc))             # general positive power (EUP)

    if mask_hw:
        # Last HW block is ragged: zero the out-of-range lanes so they do not
        # contribute to the sum.  (No-op lanes for non-final blocks.)
        col = jax.lax.broadcasted_iota(jnp.int32, xp.shape, 1) + j * block_hw
        xp = jnp.where(col < hw, xp, 0.0)

    acc_ref[...] += jnp.sum(xp, axis=-1, keepdims=True)

    @pl.when(j == pl.num_programs(1) - 1)
    def _finalize():
        # Raw mean of clamp(x,eps)**p; the 1/p power is applied outside the
        # kernel on the tiny per-row result.
        o_ref[...] = (acc_ref[...] * inv_hw).astype(o_ref.dtype)


def _choose_blocks(nc, hw, itemsize, block_nc, block_hw):
    """Pick (block_nc, block_hw) from the lane-padded row width and dtype."""
    sublane = _SUBLANE.get(itemsize, 8)
    hw_pad = _round_up(hw, _LANE)
    # Per-element VMEM cost of one block: double-buffered input at the input
    # itemsize + ~3 full-block f32 temporaries from the elementwise chain.
    bytes_per_elem = 2 * itemsize + 3 * 4

    if block_hw is None:
        if hw_pad * bytes_per_elem * sublane <= _VMEM_WORKSET_BUDGET:
            block_hw = hw                                    # whole row per step
        else:
            # Very large rows: tile HW too (multiple of 128 lanes).
            block_hw = (_VMEM_WORKSET_BUDGET // (sublane * bytes_per_elem))
            block_hw = max(_LANE, block_hw // _LANE * _LANE)
    if block_hw >= hw:
        block_hw = hw                                        # full dim: always legal
    else:
        block_hw = max(_LANE, block_hw // _LANE * _LANE)

    if block_nc is None:
        bhw_pad = _round_up(block_hw, _LANE)
        block_nc = max(sublane, _VMEM_WORKSET_BUDGET // (bhw_pad * bytes_per_elem))

    # Keep >= 2 row blocks when possible so the "parallel" axis can shard
    # across the two TensorCores on v7x (no-op on v5e/v6e).
    if nc > 2 * sublane:
        block_nc = min(block_nc, _round_up(pl.cdiv(nc, 2), sublane))

    if block_nc >= nc:
        block_nc = nc                                        # full dim: always legal
    else:
        block_nc = max(sublane, block_nc // sublane * sublane)
    return block_nc, block_hw


def gem_pallas(x, p=3.0, eps=1e-6, block_nc=None, block_hw=None):
    """GeM pooling. x: (N, C, H, W) -> (N, C, 1, 1)."""
    N, C, H, W = x.shape
    nc, hw = N * C, H * W
    p = float(p)
    x2 = x.reshape(nc, hw)                      # metadata-only reshape, no HBM copy

    block_nc, block_hw = _choose_blocks(nc, hw, x.dtype.itemsize, block_nc, block_hw)
    grid = (pl.cdiv(nc, block_nc), pl.cdiv(hw, block_hw))
    mask_hw = (hw % block_hw) != 0              # only when HW is tiled & ragged

    kernel = functools.partial(
        _gem_kernel, p=p, eps=float(eps), inv_hw=1.0 / float(hw),
        hw=hw, block_hw=block_hw, mask_hw=mask_hw,
    )

    trans = 0 if _is_int_p(p) else 2 * nc * hw  # exp+log per element otherwise
    cost = pl.CostEstimate(
        flops=int(4 * nc * hw),
        transcendentals=int(trans),
        bytes_accessed=int(nc * hw * x.dtype.itemsize + nc * 4),
    )

    mean = pl.pallas_call(
        kernel,
        out_shape=jax.ShapeDtypeStruct((nc, 1), jnp.float32),
        grid_spec=pltpu.PrefetchScalarGridSpec(
            num_scalar_prefetch=0,
            grid=grid,
            in_specs=[pl.BlockSpec((block_nc, block_hw), lambda i, j: (i, j))],
            out_specs=pl.BlockSpec((block_nc, 1), lambda i, j: (i, 0)),
            scratch_shapes=[pltpu.VMEM((block_nc, 1), jnp.float32)],
        ),
        compiler_params=pltpu.CompilerParams(
            dimension_semantics=("parallel", "arbitrary"),
            vmem_limit_bytes=_VMEM_LIMIT_BYTES,
        ),
        cost_estimate=cost,
    )(x2)

    # mean >= eps**p > 0, so the 1/p power is well defined; it touches only nc
    # elements, so plain XLA is the cheapest (and lane-dense) place for it.
    out = mean[:, 0] ** (1.0 / p)
    return out.reshape(N, C, 1, 1).astype(x.dtype)


def gem_reference(x, p=3.0, eps=1e-6):
    xc = jnp.maximum(x.astype(jnp.float32), eps)
    mean = jnp.mean(xc ** p, axis=(-2, -1), keepdims=True)
    return (mean ** (1.0 / p)).astype(x.dtype)


if __name__ == "__main__":
    key = jax.random.PRNGKey(0)
    p, eps = 3.0, 1e-6   # GeM defaults (p_trainable=False)

    # 1) Default path: single row block, full-row strip.
    x = jax.random.normal(key, (2, 4, 16, 16), dtype=jnp.float32)
    out = jax.block_until_ready(gem_pallas(x, p=p, eps=eps))
    ref = gem_reference(x, p=p, eps=eps)
    assert out.shape == (2, 4, 1, 1), out.shape
    assert jnp.allclose(out, ref, atol=1e-4, rtol=1e-4), (
        "max abs err %e" % float(jnp.max(jnp.abs(out - ref))))

    # 2) Ragged NC (nc=10, block_nc=8): pad-free multi-block path with masked
    #    tail writes.
    x2 = jax.random.normal(jax.random.PRNGKey(1), (2, 5, 16, 16), dtype=jnp.float32)
    out2 = jax.block_until_ready(gem_pallas(x2, p=p, eps=eps, block_nc=8))
    ref2 = gem_reference(x2, p=p, eps=eps)
    assert out2.shape == (2, 5, 1, 1), out2.shape
    assert jnp.allclose(out2, ref2, atol=1e-4, rtol=1e-4), (
        "max abs err %e" % float(jnp.max(jnp.abs(out2 - ref2))))

    # 3) HW-tiled reduction with ragged last HW block (hw=320, block_hw=128):
    #    exercises the accumulator + lane-mask path.
    x3 = jax.random.normal(jax.random.PRNGKey(2), (1, 8, 16, 20), dtype=jnp.float32)
    out3 = jax.block_until_ready(gem_pallas(x3, p=p, eps=eps, block_nc=8, block_hw=128))
    ref3 = gem_reference(x3, p=p, eps=eps)
    assert out3.shape == (1, 8, 1, 1), out3.shape
    assert jnp.allclose(out3, ref3, atol=1e-4, rtol=1e-4), (
        "max abs err %e" % float(jnp.max(jnp.abs(out3 - ref3))))

    # 4) Non-integer p falls back to the exp/log power path.
    out4 = jax.block_until_ready(gem_pallas(x, p=2.5, eps=eps))
    ref4 = gem_reference(x, p=2.5, eps=eps)
    assert jnp.allclose(out4, ref4, atol=1e-4, rtol=1e-4), (
        "max abs err %e" % float(jnp.max(jnp.abs(out4 - ref4))))

    # 5) bf16 input: dtype-aware sublane tiling, f32 accumulation in-kernel.
    xb = jax.random.normal(jax.random.PRNGKey(3), (2, 4, 16, 16), dtype=jnp.bfloat16)
    outb = jax.block_until_ready(gem_pallas(xb, p=p, eps=eps))
    refb = gem_reference(xb, p=p, eps=eps)
    assert outb.dtype == jnp.bfloat16 and outb.shape == (2, 4, 1, 1)
    assert jnp.allclose(outb.astype(jnp.float32), refb.astype(jnp.float32),
                        atol=2e-2, rtol=2e-2)

    print("KERNEL_OK")
</pallas_src>

<mosaic_0001>
module attributes {stable_mosaic.version = 11 : i64} {
  func.func @_gem_kernel(%arg0: i32, %arg1: i32, %arg2: memref<8x256xf32, #tpu.memory_space<vmem>>, %arg3: memref<8x1xf32, #tpu.memory_space<vmem>>, %arg4: memref<8x1xf32, #tpu.memory_space<vmem>>) attributes {dimension_semantics = [#tpu.dimension_semantics<parallel>, #tpu.dimension_semantics<arbitrary>], iteration_bounds = array<i64: 1, 1>, scalar_prefetch = 0 : i64, scratch_operands = 1 : i64, tpu.core_type = #tpu.core_type<tc>, window_params = [{transform_indices = @transform_0, window_bounds = array<i64: 8, 256>}, {transform_indices = @transform_1, window_bounds = array<i64: 8, 1>}]} {
    %c0_i32 = arith.constant 0 : i32
    %0 = arith.cmpi eq, %arg1, %c0_i32 : i32
    %1 = arith.extui %0 : i1 to i32
    %c0_i32_0 = arith.constant 0 : i32
    %2 = arith.cmpi ne, %1, %c0_i32_0 : i32
    scf.if %2 {
      %cst_9 = arith.constant 0.000000e+00 : f32
      %16 = vector.broadcast %cst_9 : f32 to vector<8x1xf32>
      %c0_10 = arith.constant 0 : index
      %c0_11 = arith.constant 0 : index
      %17 = vector.load %arg4[%c0_10, %c0_11] : memref<8x1xf32, #tpu.memory_space<vmem>>, vector<8x1xf32>
      tpu.vector_store %arg4[%c0_10, %c0_11], %16 {strides = array<i32>} : memref<8x1xf32, #tpu.memory_space<vmem>>, vector<8x1xf32>,
    } else {
    }
    %c0 = arith.constant 0 : index
    %c0_1 = arith.constant 0 : index
    %3 = vector.load %arg2[%c0, %c0_1] : memref<8x256xf32, #tpu.memory_space<vmem>>, vector<8x256xf32>
    %cst = arith.constant 9.99999997E-7 : f32
    %4 = vector.broadcast %cst : f32 to vector<8x256xf32>
    %5 = arith.maximumf %3, %4 : vector<8x256xf32>
    %6 = arith.mulf %5, %5 : vector<8x256xf32>
    %7 = arith.mulf %5, %6 : vector<8x256xf32>
    %c0_2 = arith.constant 0 : index
    %c0_3 = arith.constant 0 : index
    %8 = vector.load %arg4[%c0_2, %c0_3] : memref<8x1xf32, #tpu.memory_space<vmem>>, vector<8x1xf32>
    %cst_4 = arith.constant dense<0.000000e+00> : vector<8xf32>
    %9 = vector.multi_reduction <add>, %7, %cst_4 [1] : vector<8x256xf32> to vector<8xf32>
    %10 = vector.shape_cast %9 : vector<8xf32> to vector<8x1xf32>
    %11 = arith.addf %8, %10 : vector<8x1xf32>
    %c0_5 = arith.constant 0 : index
    %c0_6 = arith.constant 0 : index
    %12 = vector.load %arg4[%c0_5, %c0_6] : memref<8x1xf32, #tpu.memory_space<vmem>>, vector<8x1xf32>
    tpu.vector_store %arg4[%c0_5, %c0_6], %11 {strides = array<i32>} : memref<8x1xf32, #tpu.memory_space<vmem>>, vector<8x1xf32>,
    %c0_i32_7 = arith.constant 0 : i32
    %13 = arith.cmpi eq, %arg1, %c0_i32_7 : i32
    %14 = arith.extui %13 : i1 to i32
    %c0_i32_8 = arith.constant 0 : i32
    %15 = arith.cmpi ne, %14, %c0_i32_8 : i32
    scf.if %15 {
      %c0_9 = arith.constant 0 : index
      %c0_10 = arith.constant 0 : index
      %16 = vector.load %arg4[%c0_9, %c0_10] : memref<8x1xf32, #tpu.memory_space<vmem>>, vector<8x1xf32>
      %cst_11 = arith.constant 3.906250e-03 : f32
      %17 = vector.broadcast %cst_11 : f32 to vector<8x1xf32>
      %18 = arith.mulf %16, %17 : vector<8x1xf32>
      %c0_12 = arith.constant 0 : index
      %c0_13 = arith.constant 0 : index
      %19 = vector.load %arg3[%c0_12, %c0_13] : memref<8x1xf32, #tpu.memory_space<vmem>>, vector<8x1xf32>
      tpu.vector_store %arg3[%c0_12, %c0_13], %18 {strides = array<i32>} : memref<8x1xf32, #tpu.memory_space<vmem>>, vector<8x1xf32>,
    } else {
    }
    return
  }
  func.func @transform_0(%arg0: i32, %arg1: i32) -> (i32, i32) {
    %c0_i32 = arith.constant 0 : i32
    return %arg0, %arg1 : i32, i32
  }
  func.func @transform_1(%arg0: i32, %arg1: i32) -> (i32, i32) {
    %c0_i32 = arith.constant 0 : i32
    %c0_i32_0 = arith.constant 0 : i32
    return %arg0, %c0_i32 : i32, i32
  }
}

</mosaic_0001>

<bundles_post_ra>
// kernel: tpu_custom_call.1
= control target key start
LH: loop header
LB: loop body
LE: loop exit
PB: predicated region body
PF: predicated region fallthrough
CT: control target
= control target key end

     0   :  { %6 = vsyncpa [#allocation4], 0  ;;  %s78_s6 = smov [#allocation3]   ;;  %s108_s0 = inlined_call_operand.hbm [shape: f32[8,256], index: 0, kind: input, shape index: {}]   ;;  %s109_s1 = inlined_call_operand.vmem [shape: f32[8,1], index: 1, kind: output, shape index: {}]  }
   0x1   :  { %s13_s7 = sshll.u32 %s78_s6, 4  ;;  %s54_s10 = scalar_lea.hbm %s108_s0, 256  ;;  %s14_s7 = int_to_ptr.vmem [resolvable:$true] %s13_s7 }
   0x2   :  { %p55_p0 = scmp.ne.s32.totalorder %s108_s0, %s54_s10  ;;  %p58_p1 = scmp.lt.u32.totalorder %s54_s10, %s108_s0 }
   0x4   :  { %p60_p2 = pnand %p58_p1, %p55_p0 }
   0x6   :  { %63 = shalt.err (!%p60_p2)
}
   0x7   :  { %s64_s15 = scalar_lea.vmem %s14_s7, 256  ;;  %p69_p4 = scmp.lt.s32.totalorder %s14_s7, %s14_s7 }
   0x8   :  { %p65_p3 = scmp.ne.s32.totalorder %s14_s7, %s64_s15  ;;  %p70_p5 = scmp.lt.s32.totalorder %s64_s15, %s64_s15 }
   0xa   :  { %p71_p6 = por %p70_p5, %p69_p4 }
   0xc   :  { %p72_p7 = pnand %p71_p6, %p65_p3 }
   0xe   :  { %75 = shalt.err (!%p72_p7)
}
   0xf   :  { %16 = dma.hbm_to_vmem [thread:$0]  %s108_s0, 256, %s14_s7, [#allocation4]  }
  0x10   :  { %76 = dma.done.wait [#allocation4], 256  }
  0x11   :  { %77 = vsyncadd [#allocation4], 4294967040  ;;  %vm24_vm0 = vcmask 7168   ;;  %v79_v0 = vmov 0.0   ;;  %v26_v1 = vld [vmem:[#allocation3] sm:$0xff]  ;;  %v27_v2 = vld [vmem:[#allocation3 + $0x8] sm:$0xff] }
  0x12   :  { %25 = vst.msk [vmem:[#allocation2] sm:$0xff] %vm24_vm0, %v79_v0  ;;  %v28_v3 = vmax.f32 %v26_v1, 1e-06  ;;  %v29_v4 = vmax.f32 %v27_v2, 1e-06 }
  0x14   :  { %v30_v5 = vmul.f32 %v28_v3, %v28_v3  ;;  %v31_v6 = vmul.f32 %v29_v4, %v29_v4 }
  0x16   :  { %v32_v7 = vmul.f32 %v30_v5, %v28_v3  ;;  %v33_v8 = vmul.f32 %v31_v6, %v29_v4 }
  0x18   :  { %v35_v9 = vadd.f32 %v33_v8, %v32_v7 }
  0x19   :  { %v34_v10 = vld [vmem:[#allocation2] sm:$0xff] }
  0x1a   :  { %36 = vadd.xlane.f32.xlu0 %v35_v9 }
  0xa7   :  { %v37_v11 = vpop.xlane.xlu0 %36 }
  0xa8   :  { %v38_v12 = vadd.f32 %v37_v11, %v34_v10 }
  0xaa   :  { %40 = vst.msk [vmem:[#allocation2] sm:$0xff] %vm24_vm0, %v38_v12 }
  0xb1   :  { %v44_v13 = vld [vmem:[#allocation2] sm:$0xff] }
  0xb2   :  { %v45_v14 = vmul.f32 0.00390625, %v44_v13 }
  0xb4   :  { %46 = vst.msk [vmem:[%s109_s1] sm:$0xff] %vm24_vm0, %v45_v14 }
  0xb5   :  { %51 = vsyncpa [#allocation4], 1 }

</bundles_post_ra>
